<compile_context>
chip_gen: v7x
topology: tpu7x:2x2x1
jax: 0.10.0
libtpu: 0.0.40
codegen_flags: <defaults>
</compile_context>

<pallas_src>
import numpy as np
import jax
import jax.numpy as jnp
from jax import lax
from jax.experimental import pallas as pl
from jax.experimental.pallas import tpu as pltpu


def _round_up(x, m):
    return ((x + m - 1) // m) * m


def _tpu_generation():
    try:
        kind = jax.devices()[0].device_kind.lower()
    except Exception:
        return "other"
    if "7" in kind:
        return "v7x"
    if "v6" in kind:
        return "v6e"
    if "v5" in kind:
        return "v5e"
    return "other"


def _mask_dtype_for(gen):
    """Narrowest MXU-native dtype in which 0/1 is exact, plus accumulation dtype."""
    if gen == "v7x":
        return getattr(jnp, "float8_e4m3fn", jnp.bfloat16), jnp.float32
    if gen in ("v5e", "v6e"):
        return jnp.int8, jnp.int32
    return jnp.bfloat16, jnp.float32


def _make_kernel(N, TM, per_core, acc_dtype):
    def kernel(bz_ref, bzt_ref, efs_ref, wt_ref, out_ref):
        c = pl.program_id(0)          # core / partial-output slot (parallel axis)
        i = pl.program_id(1)          # row-block index within this core (reduction)

        @pl.when(i == 0)
        def _init():
            out_ref[...] = jnp.zeros_like(out_ref)

        # excl[r, j] = #{ k : Bz[row_r, k] == 1 and Bz[j, k] == 1 }.
        # The zeroed diagonal of Bz makes the k == row_r / k == j exclusions automatic.
        excl = jnp.dot(bz_ref[...], bzt_ref[...],
                       preferred_element_type=acc_dtype)               # (TM, N)

        row0 = (c * per_core + i) * TM
        row_g = lax.broadcasted_iota(jnp.int32, (TM, N), 0) + row0
        col = lax.broadcasted_iota(jnp.int32, (TM, N), 1)
        line = jnp.logical_and(excl > 0, row_g != col).astype(jnp.float32)  # (TM, N)

        # agg[row] = sum_j line[row, j] * ef_rowsum[j]   (lane-dense (1, TM) row)
        agg = lax.dot_general(efs_ref[...], line, (((1,), (1,)), ((), ())),
                              preferred_element_type=jnp.float32)      # (1, TM)

        # Partial contribution of this row block to the linear layer.
        out_ref[...] += jnp.dot(agg, wt_ref[...],
                                preferred_element_type=jnp.float32)    # (1, O)

    return kernel


def edge_message_passing(adjacency_matrix, edge_features, weight, bias):
    """Forward of EdgeMessagePassingLayer.

    weight: (output_size, input_size) as nn.Linear stores it; bias: (output_size,).
    Requires input_size == num_nodes (torch's sum(dim=1) yields a length-N vector).
    """
    adj = adjacency_matrix.astype(jnp.float32)
    ef = edge_features.astype(jnp.float32)
    N = adj.shape[0]
    O, In = weight.shape
    assert In == N, "nn.Linear input_size must equal num_nodes"

    gen = _tpu_generation()
    n_cores = 2 if gen == "v7x" else 1

    # Row-block size: generation-aware (v7x has half the VMEM of v5e/v6e).
    n128 = _round_up(N, 128)
    tm_candidates = (256, 128) if gen == "v7x" else (512, 256, 128)
    TM = next(t for t in tm_candidates if n128 % t == 0)
    N_pad = _round_up(n128, TM * n_cores)            # zero padding is inert (see below)
    n_blocks = N_pad // TM
    per_core = n_blocks // n_cores

    # --- wrapper-side (XLA) precompute: cheap O(N^2), keeps the kernel lean ------
    # Exact "== 1" compare replicates the torch semantics (only bit-exact 1.0 counts).
    B = (adj == 1.0).astype(jnp.float32)
    Bz = B * (1.0 - jnp.eye(N, dtype=jnp.float32))   # diagonal-zeroed 0/1 mask
    Bz = jnp.pad(Bz, ((0, N_pad - N), (0, N_pad - N)))
    # Padded rows/cols are all-zero -> excl/line are zero there -> no contribution.

    # sum(dim=1) commutes with L @ ef: only the row-sum of edge_features is needed.
    ef_rowsum = jnp.pad(jnp.sum(ef, axis=1), (0, N_pad - N)).reshape(1, N_pad)
    wt = jnp.pad(jnp.transpose(weight).astype(jnp.float32),
                 ((0, N_pad - N), (0, 0)))           # (N_pad, O), zero rows for padding

    def build_and_run(mask_dtype, acc_dtype, single_buffer_resident):
        bz = Bz.astype(mask_dtype)                   # streamed in (TM, N_pad) row blocks
        bzt = jnp.transpose(Bz).astype(mask_dtype)   # resident (N_pad, N_pad)
        mb = jnp.dtype(mask_dtype).itemsize
        resident_mode = (dict(pipeline_mode=pl.Buffered(1))
                         if single_buffer_resident else {})

        # VMEM budget policy (only raise the scoped limit when actually needed).
        est = ((1 if single_buffer_resident else 2) * N_pad * N_pad * mb  # Bz^T
               + 2 * TM * N_pad * mb                 # streamed Bz row blocks
               + 2 * TM * O * 4                      # streamed W^T row blocks
               + 16 * TM * N_pad                     # excl/line/iota f32-i32 temporaries
               + 8 * N_pad + 8 * O + (1 << 16))
        default_scoped = (16 << 20) if gen == "v5e" else (32 << 20)
        cap = (56 << 20) if gen == "v7x" else (100 << 20)
        want = int(est * 1.25)
        vmem_limit = None if want <= default_scoped else min(want, cap)

        call = pl.pallas_call(
            _make_kernel(N_pad, TM, per_core, acc_dtype),
            out_shape=jax.ShapeDtypeStruct((n_cores, O), jnp.float32),
            grid_spec=pltpu.PrefetchScalarGridSpec(
                num_scalar_prefetch=0,
                grid=(n_cores, per_core),
                in_specs=[
                    # Bz row block, streamed (double-buffered).
                    pl.BlockSpec((TM, N_pad), lambda c, i: (c * per_core + i, 0)),
                    # Bz^T, resident (constant index map) -> single-buffered.
                    pl.BlockSpec((N_pad, N_pad), lambda c, i: (0, 0), **resident_mode),
                    # ef row-sum, resident.
                    pl.BlockSpec((1, N_pad), lambda c, i: (0, 0), **resident_mode),
                    # W^T row block, streamed.
                    pl.BlockSpec((TM, O), lambda c, i: (c * per_core + i, 0)),
                ],
                out_specs=pl.BlockSpec((1, O), lambda c, i: (c, 0)),
            ),
            compiler_params=pltpu.CompilerParams(
                dimension_semantics=("parallel", "arbitrary"),
                vmem_limit_bytes=vmem_limit),
        )
        return jax.block_until_ready(call(bz, bzt, ef_rowsum, wt))   # (n_cores, O)

    mask_dtype, acc_dtype = _mask_dtype_for(gen)
    try:
        partials = build_and_run(mask_dtype, acc_dtype, True)
    except Exception:
        # Safe fallback: bf16 mask (exact for 0/1) + default double buffering, the
        # configuration already proven to compile on all generations.
        partials = build_and_run(jnp.bfloat16, jnp.float32, False)

    return jnp.sum(partials, axis=0) + bias.astype(jnp.float32)      # (output_size,)


def numpy_reference(adj, ef, W, b):
    """Direct translation of the PyTorch forward (loops and all)."""
    N = adj.shape[0]
    L = np.zeros((N, N), dtype=np.float32)
    for i in range(N):
        for j in range(N):
            if i != j:
                for k in range(N):
                    if k != i and k != j and adj[i][k] == 1 and adj[j][k] == 1:
                        L[i][j] = 1.0
                        L[j][i] = 1.0
    messages = L @ ef
    agg = messages.sum(axis=1)
    return W @ agg + b


if __name__ == "__main__":
    N = 8            # num_nodes == input_size (required by the forward semantics)
    D = 16           # per-edge feature width (summed away by the dim=1 reduction)
    OUT = 32         # output_size

    key = jax.random.PRNGKey(0)
    k_adj, k_ef, k_w, k_b = jax.random.split(key, 4)

    # Symmetric 0/1 adjacency with zero diagonal (exact 0/1 per the torch "== 1" contract).
    raw = (jax.random.uniform(k_adj, (N, N)) > 0.5).astype(jnp.float32)
    adj = jnp.maximum(raw, raw.T)
    adj = adj * (1.0 - jnp.eye(N, dtype=jnp.float32))

    edge_features = jax.random.normal(k_ef, (N, D), dtype=jnp.float32)

    # Deterministic nn.Linear-style init: U(-1/sqrt(in), 1/sqrt(in)).
    bound = 1.0 / np.sqrt(N)
    weight = jax.random.uniform(k_w, (OUT, N), minval=-bound, maxval=bound,
                                dtype=jnp.float32)
    bias = jax.random.uniform(k_b, (OUT,), minval=-bound, maxval=bound,
                              dtype=jnp.float32)

    out = edge_message_passing(adj, edge_features, weight, bias)
    out = jax.block_until_ready(out)

    ref = numpy_reference(np.asarray(adj), np.asarray(edge_features),
                          np.asarray(weight), np.asarray(bias))
    np.testing.assert_allclose(np.asarray(out), ref, rtol=1e-5, atol=1e-5)

    print("KERNEL_OK")
</pallas_src>

<mosaic_0001>
module attributes {stable_mosaic.version = 11 : i64} {
  func.func @kernel(%arg0: i32, %arg1: i32, %arg2: memref<128x128xbf16, #tpu.memory_space<vmem>>, %arg3: memref<128x128xbf16, #tpu.memory_space<vmem>>, %arg4: memref<1x128xf32, #tpu.memory_space<vmem>>, %arg5: memref<128x32xf32, #tpu.memory_space<vmem>>, %arg6: memref<1x32xf32, #tpu.memory_space<vmem>>) attributes {dimension_semantics = [#tpu.dimension_semantics<parallel>, #tpu.dimension_semantics<arbitrary>], iteration_bounds = array<i64: 1, 1>, scalar_prefetch = 0 : i64, scratch_operands = 0 : i64, tpu.core_type = #tpu.core_type<tc>, window_params = [{transform_indices = @transform_0, window_bounds = array<i64: 128, 128>}, {pipeline_mode = #tpu.pipeline_mode<synchronous>, transform_indices = @transform_1, window_bounds = array<i64: 128, 128>}, {pipeline_mode = #tpu.pipeline_mode<synchronous>, transform_indices = @transform_2, window_bounds = array<i64: 1, 128>}, {transform_indices = @transform_3, window_bounds = array<i64: 128, 32>}, {transform_indices = @transform_4, window_bounds = array<i64: 1, 32>}]} {
    %c0_i32 = arith.constant 0 : i32
    %0 = arith.cmpi eq, %arg1, %c0_i32 : i32
    %1 = arith.extui %0 : i1 to i32
    %c0_i32_0 = arith.constant 0 : i32
    %2 = arith.cmpi ne, %1, %c0_i32_0 : i32
    scf.if %2 {
      %cst_15 = arith.constant 0.000000e+00 : f32
      %26 = vector.broadcast %cst_15 : f32 to vector<1x32xf32>
      %c0_16 = arith.constant 0 : index
      %c0_17 = arith.constant 0 : index
      %27 = vector.load %arg6[%c0_16, %c0_17] : memref<1x32xf32, #tpu.memory_space<vmem>>, vector<1x32xf32>
      tpu.vector_store %arg6[%c0_16, %c0_17], %26 {strides = array<i32>} : memref<1x32xf32, #tpu.memory_space<vmem>>, vector<1x32xf32>,
    } else {
    }
    %c0 = arith.constant 0 : index
    %c0_1 = arith.constant 0 : index
    %3 = vector.load %arg2[%c0, %c0_1] : memref<128x128xbf16, #tpu.memory_space<vmem>>, vector<128x128xbf16>
    %c0_2 = arith.constant 0 : index
    %c0_3 = arith.constant 0 : index
    %4 = vector.load %arg3[%c0_2, %c0_3] : memref<128x128xbf16, #tpu.memory_space<vmem>>, vector<128x128xbf16>
    %cst = arith.constant dense<0.000000e+00> : vector<128x128xf32>
    %5 = tpu.matmul %3, %4, %cst {dimension_numbers = #tpu.dot_dimension_numbers<[1], [0], [0], [1], [0, 0, 1, 1], [], []>} : vector<128x128xbf16>, vector<128x128xbf16>, vector<128x128xf32> -> vector<128x128xf32>
    %c1_i32 = arith.constant 1 : i32
    %6 = arith.muli %arg0, %c1_i32 : i32
    %7 = arith.addi %6, %arg1 : i32
    %c128_i32 = arith.constant 128 : i32
    %8 = arith.muli %7, %c128_i32 : i32
    %9 = tpu.iota {dimensions = array<i32: 0>} : vector<128x128xi32>
    %10 = vector.broadcast %8 : i32 to vector<128x128xi32>
    %11 = arith.addi %9, %10 : vector<128x128xi32>
    %12 = tpu.iota {dimensions = array<i32: 1>} : vector<128x128xi32>
    %cst_4 = arith.constant 0.000000e+00 : f32
    %13 = vector.broadcast %cst_4 : f32 to vector<128x128xf32>
    %14 = arith.cmpf ogt, %5, %13 : vector<128x128xf32>
    %15 = arith.cmpi ne, %11, %12 : vector<128x128xi32>
    %16 = arith.andi %14, %15 : vector<128x128xi1>
    %17 = arith.extui %16 : vector<128x128xi1> to vector<128x128xi32>
    %18 = arith.sitofp %17 : vector<128x128xi32> to vector<128x128xf32>
    %c0_5 = arith.constant 0 : index
    %c0_6 = arith.constant 0 : index
    %19 = vector.load %arg4[%c0_5, %c0_6] : memref<1x128xf32, #tpu.memory_space<vmem>>, vector<1x128xf32>
    %cst_7 = arith.constant dense<0.000000e+00> : vector<1x128xf32>
    %20 = tpu.matmul %19, %18, %cst_7 {dimension_numbers = #tpu.dot_dimension_numbers<[1], [1], [0], [0], [0, 0, 1, 0], [], []>} : vector<1x128xf32>, vector<128x128xf32>, vector<1x128xf32> -> vector<1x128xf32>
    %c0_8 = arith.constant 0 : index
    %c0_9 = arith.constant 0 : index
    %21 = vector.load %arg6[%c0_8, %c0_9] : memref<1x32xf32, #tpu.memory_space<vmem>>, vector<1x32xf32>
    %c0_10 = arith.constant 0 : index
    %c0_11 = arith.constant 0 : index
    %22 = vector.load %arg5[%c0_10, %c0_11] : memref<128x32xf32, #tpu.memory_space<vmem>>, vector<128x32xf32>
    %cst_12 = arith.constant dense<0.000000e+00> : vector<1x32xf32>
    %23 = tpu.matmul %20, %22, %cst_12 {dimension_numbers = #tpu.dot_dimension_numbers<[1], [0], [0], [1], [0, 0, 1, 1], [], []>} : vector<1x128xf32>, vector<128x32xf32>, vector<1x32xf32> -> vector<1x32xf32>
    %24 = arith.addf %21, %23 : vector<1x32xf32>
    %c0_13 = arith.constant 0 : index
    %c0_14 = arith.constant 0 : index
    %25 = vector.load %arg6[%c0_13, %c0_14] : memref<1x32xf32, #tpu.memory_space<vmem>>, vector<1x32xf32>
    tpu.vector_store %arg6[%c0_13, %c0_14], %24 {strides = array<i32>} : memref<1x32xf32, #tpu.memory_space<vmem>>, vector<1x32xf32>,
    return
  }
  func.func @transform_0(%arg0: i32, %arg1: i32) -> (i32, i32) {
    %c1_i32 = arith.constant 1 : i32
    %0 = arith.muli %arg0, %c1_i32 : i32
    %1 = arith.addi %0, %arg1 : i32
    %c0_i32 = arith.constant 0 : i32
    %c0_i32_0 = arith.constant 0 : i32
    return %1, %c0_i32 : i32, i32
  }
  func.func @transform_1(%arg0: i32, %arg1: i32) -> (i32, i32) {
    %c0_i32 = arith.constant 0 : i32
    %c0_i32_0 = arith.constant 0 : i32
    %c0_i32_1 = arith.constant 0 : i32
    return %c0_i32, %c0_i32_0 : i32, i32
  }
  func.func @transform_2(%arg0: i32, %arg1: i32) -> (i32, i32) {
    %c0_i32 = arith.constant 0 : i32
    %c0_i32_0 = arith.constant 0 : i32
    %c0_i32_1 = arith.constant 0 : i32
    return %c0_i32, %c0_i32_0 : i32, i32
  }
  func.func @transform_3(%arg0: i32, %arg1: i32) -> (i32, i32) {
    %c1_i32 = arith.constant 1 : i32
    %0 = arith.muli %arg0, %c1_i32 : i32
    %1 = arith.addi %0, %arg1 : i32
    %c0_i32 = arith.constant 0 : i32
    %c0_i32_0 = arith.constant 0 : i32
    return %1, %c0_i32 : i32, i32
  }
  func.func @transform_4(%arg0: i32, %arg1: i32) -> (i32, i32) {
    %c0_i32 = arith.constant 0 : i32
    %c0_i32_0 = arith.constant 0 : i32
    return %arg0, %c0_i32 : i32, i32
  }
}

module attributes {stable_mosaic.version = 11 : i64} {
  func.func @kernel(%arg0: i32, %arg1: i32, %arg2: memref<128x128xbf16, #tpu.memory_space<vmem>>, %arg3: memref<128x128xbf16, #tpu.memory_space<vmem>>, %arg4: memref<1x128xf32, #tpu.memory_space<vmem>>, %arg5: memref<128x32xf32, #tpu.memory_space<vmem>>, %arg6: memref<1x32xf32, #tpu.memory_space<vmem>>) attributes {dimension_semantics = [#tpu.dimension_semantics<parallel>, #tpu.dimension_semantics<arbitrary>], iteration_bounds = array<i64: 1, 1>, scalar_prefetch = 0 : i64, scratch_operands = 0 : i64, tpu.core_type = #tpu.core_type<tc>, window_params = [{transform_indices = @transform_0, window_bounds = array<i64: 128, 128>}, {pipeline_mode = #tpu.pipeline_mode<synchronous>, transform_indices = @transform_1, window_bounds = array<i64: 128, 128>}, {pipeline_mode = #tpu.pipeline_mode<synchronous>, transform_indices = @transform_2, window_bounds = array<i64: 1, 128>}, {transform_indices = @transform_3, window_bounds = array<i64: 128, 32>}, {transform_indices = @transform_4, window_bounds = array<i64: 1, 32>}]} {
    %c0_i32 = arith.constant 0 : i32
    %0 = arith.cmpi eq, %arg1, %c0_i32 : i32
    %1 = arith.extui %0 : i1 to i32
    %c0_i32_0 = arith.constant 0 : i32
    %2 = arith.cmpi ne, %1, %c0_i32_0 : i32
    scf.if %2 {
      %cst_15 = arith.constant 0.000000e+00 : f32
      %26 = vector.broadcast %cst_15 : f32 to vector<1x32xf32>
      %c0_16 = arith.constant 0 : index
      %c0_17 = arith.constant 0 : index
      %27 = vector.load %arg6[%c0_16, %c0_17] : memref<1x32xf32, #tpu.memory_space<vmem>>, vector<1x32xf32>
      tpu.vector_store %arg6[%c0_16, %c0_17], %26 {strides = array<i32>} : memref<1x32xf32, #tpu.memory_space<vmem>>, vector<1x32xf32>,
    } else {
    }
    %c0 = arith.constant 0 : index
    %c0_1 = arith.constant 0 : index
    %3 = vector.load %arg2[%c0, %c0_1] : memref<128x128xbf16, #tpu.memory_space<vmem>>, vector<128x128xbf16>
    %c0_2 = arith.constant 0 : index
    %c0_3 = arith.constant 0 : index
    %4 = vector.load %arg3[%c0_2, %c0_3] : memref<128x128xbf16, #tpu.memory_space<vmem>>, vector<128x128xbf16>
    %cst = arith.constant dense<0.000000e+00> : vector<128x128xf32>
    %5 = tpu.matmul %3, %4, %cst {dimension_numbers = #tpu.dot_dimension_numbers<[1], [0], [0], [1], [0, 0, 1, 1], [], []>} : vector<128x128xbf16>, vector<128x128xbf16>, vector<128x128xf32> -> vector<128x128xf32>
    %c1_i32 = arith.constant 1 : i32
    %6 = arith.muli %arg0, %c1_i32 : i32
    %7 = arith.addi %6, %arg1 : i32
    %c128_i32 = arith.constant 128 : i32
    %8 = arith.muli %7, %c128_i32 : i32
    %9 = tpu.iota {dimensions = array<i32: 0>} : vector<128x128xi32>
    %10 = vector.broadcast %8 : i32 to vector<128x128xi32>
    %11 = arith.addi %9, %10 : vector<128x128xi32>
    %12 = tpu.iota {dimensions = array<i32: 1>} : vector<128x128xi32>
    %cst_4 = arith.constant 0.000000e+00 : f32
    %13 = vector.broadcast %cst_4 : f32 to vector<128x128xf32>
    %14 = arith.cmpf ogt, %5, %13 : vector<128x128xf32>
    %15 = arith.cmpi ne, %11, %12 : vector<128x128xi32>
    %16 = arith.andi %14, %15 : vector<128x128xi1>
    %17 = arith.extui %16 : vector<128x128xi1> to vector<128x128xi32>
    %18 = arith.sitofp %17 : vector<128x128xi32> to vector<128x128xf32>
    %c0_5 = arith.constant 0 : index
    %c0_6 = arith.constant 0 : index
    %19 = vector.load %arg4[%c0_5, %c0_6] : memref<1x128xf32, #tpu.memory_space<vmem>>, vector<1x128xf32>
    %cst_7 = arith.constant dense<0.000000e+00> : vector<1x128xf32>
    %20 = tpu.matmul %19, %18, %cst_7 {dimension_numbers = #tpu.dot_dimension_numbers<[1], [1], [0], [0], [0, 0, 1, 0], [], []>} : vector<1x128xf32>, vector<128x128xf32>, vector<1x128xf32> -> vector<1x128xf32>
    %c0_8 = arith.constant 0 : index
    %c0_9 = arith.constant 0 : index
    %21 = vector.load %arg6[%c0_8, %c0_9] : memref<1x32xf32, #tpu.memory_space<vmem>>, vector<1x32xf32>
    %c0_10 = arith.constant 0 : index
    %c0_11 = arith.constant 0 : index
    %22 = vector.load %arg5[%c0_10, %c0_11] : memref<128x32xf32, #tpu.memory_space<vmem>>, vector<128x32xf32>
    %cst_12 = arith.constant dense<0.000000e+00> : vector<1x32xf32>
    %23 = tpu.matmul %20, %22, %cst_12 {dimension_numbers = #tpu.dot_dimension_numbers<[1], [0], [0], [1], [0, 0, 1, 1], [], []>} : vector<1x128xf32>, vector<128x32xf32>, vector<1x32xf32> -> vector<1x32xf32>
    %24 = arith.addf %21, %23 : vector<1x32xf32>
    %c0_13 = arith.constant 0 : index
    %c0_14 = arith.constant 0 : index
    %25 = vector.load %arg6[%c0_13, %c0_14] : memref<1x32xf32, #tpu.memory_space<vmem>>, vector<1x32xf32>
    tpu.vector_store %arg6[%c0_13, %c0_14], %24 {strides = array<i32>} : memref<1x32xf32, #tpu.memory_space<vmem>>, vector<1x32xf32>,
    return
  }
  func.func @transform_0(%arg0: i32, %arg1: i32) -> (i32, i32) {
    %c1_i32 = arith.constant 1 : i32
    %0 = arith.muli %arg0, %c1_i32 : i32
    %1 = arith.addi %0, %arg1 : i32
    %c0_i32 = arith.constant 0 : i32
    %c0_i32_0 = arith.constant 0 : i32
    return %1, %c0_i32 : i32, i32
  }
  func.func @transform_1(%arg0: i32, %arg1: i32) -> (i32, i32) {
    %c0_i32 = arith.constant 0 : i32
    %c0_i32_0 = arith.constant 0 : i32
    %c0_i32_1 = arith.constant 0 : i32
    return %c0_i32, %c0_i32_0 : i32, i32
  }
  func.func @transform_2(%arg0: i32, %arg1: i32) -> (i32, i32) {
    %c0_i32 = arith.constant 0 : i32
    %c0_i32_0 = arith.constant 0 : i32
    %c0_i32_1 = arith.constant 0 : i32
    return %c0_i32, %c0_i32_0 : i32, i32
  }
  func.func @transform_3(%arg0: i32, %arg1: i32) -> (i32, i32) {
    %c1_i32 = arith.constant 1 : i32
    %0 = arith.muli %arg0, %c1_i32 : i32
    %1 = arith.addi %0, %arg1 : i32
    %c0_i32 = arith.constant 0 : i32
    %c0_i32_0 = arith.constant 0 : i32
    return %1, %c0_i32 : i32, i32
  }
  func.func @transform_4(%arg0: i32, %arg1: i32) -> (i32, i32) {
    %c0_i32 = arith.constant 0 : i32
    %c0_i32_0 = arith.constant 0 : i32
    return %arg0, %c0_i32 : i32, i32
  }
}

</mosaic_0001>

<bundles_post_ra>
// kernel: tpu_custom_call.1
= control target key start
LH: loop header
LB: loop body
LE: loop exit
PB: predicated region body
PF: predicated region fallthrough
CT: control target
= control target key end

     0   :  { %s1198_s0 = inlined_call_operand.vmem [shape: bf16[128,128], index: 0, kind: input, shape index: {}]   ;;  %s1199_s1 = inlined_call_operand.vmem [shape: bf16[128,128], index: 1, kind: input, shape index: {}]   ;;  %s1200_s2 = inlined_call_operand.vmem [shape: f32[1,128], index: 2, kind: input, shape index: {}]   ;;  %s1201_s3 = inlined_call_operand.vmem [shape: f32[128,32], index: 3, kind: input, shape index: {}]   ;;  %s1202_s4 = inlined_call_operand.hbm [shape: f32[1,32], index: 4, kind: output, shape index: {}]  }
   0x1   :  { %v852_v0 = vld [vmem:[%s1199_s1] sm:$0xff]   ;;  %v853_v1 = vld [vmem:[%s1199_s1 + $0x8] sm:$0xff]   ;;  %v854_v2 = vld [vmem:[%s1199_s1 + $0x10] sm:$0xff]  }
   0x2   :  { %697 = vmatprep.subr.bf16.mxu0 %v852_v0  ;;  %v855_v3 = vld [vmem:[%s1199_s1 + $0x18] sm:$0xff]   ;;  %v860_v4 = vld [vmem:[%s1198_s0] sm:$0xff]   ;;  %v857_v6 = vld [vmem:[%s1199_s1 + $0x28] sm:$0xff]  }
   0x3   :  { %698 = vmatpush3.bf16.msra.mxu0 %v852_v0  ;;  %713 = vmatprep.mubr.bf16.mxu0 %v860_v4  ;;  %v856_v5 = vld [vmem:[%s1199_s1 + $0x20] sm:$0xff]  }
   0x4   :  { %699 = vmatprep.subr.bf16.mxu0 %v853_v1 }
   0x7   :  { %700 = vmatpush3.bf16.msra.mxu0 %v853_v1 }
   0x8   :  { %701 = vmatprep.subr.bf16.mxu0 %v854_v2 }
   0xb   :  { %702 = vmatpush3.bf16.msra.mxu0 %v854_v2 }
   0xc   :  { %703 = vmatprep.subr.bf16.mxu0 %v855_v3 }
   0xf   :  { %704 = vmatpush3.bf16.msra.mxu0 %v855_v3 }
  0x10   :  { %705 = vmatprep.subr.bf16.mxu0 %v856_v5 }
  0x11   :  { %9 = vsyncpa [#allocation3], 0  ;;  %v858_v7 = vld [vmem:[%s1199_s1 + $0x30] sm:$0xff]   ;;  %v859_v8 = vld [vmem:[%s1199_s1 + $0x38] sm:$0xff]   ;;  %v892_v16 = vmov 0.0|0.0   ;;  %vm1203_vm0 = vcmask 253952   ;;  %v296_v42 = vlaneseq }
  0x12   :  { %v861_v9 = vld [vmem:[%s1198_s0 + $0x8] sm:$0xff]   ;;  %v862_v10 = vld [vmem:[%s1198_s0 + $0x10] sm:$0xff]   ;;  %v863_v11 = vld [vmem:[%s1198_s0 + $0x18] sm:$0xff]   ;;  %799 = vmatprep.subr.bf16.mxu1 %v892_v16  ;;  %v893_v17 = vmov 0.0   ;;  %vm894_vm1 = vmmov 0   ;;  %s896_s24 = smov [#allocation2]  }
  0x13   :  { %706 = vmatpush3.bf16.msra.mxu0 %v856_v5  ;;  %v864_v12 = vld [vmem:[%s1198_s0 + $0x20] sm:$0xff]   ;;  %v865_v13 = vld [vmem:[%s1198_s0 + $0x28] sm:$0xff]   ;;  %v866_v14 = vld [vmem:[%s1198_s0 + $0x30] sm:$0xff]   ;;  %68 = vst.msk [vmem:[#allocation2] sm:$0x1] %vm1203_vm0, %v893_v17  ;;  %761 = vmatprep.mubr.msk.f32.mxu1 %vm894_vm1, %v893_v17  ;;  %v1028_v43 = vshrl.u32 %v296_v42, 7 }
  0x14   :  { %707 = vmatprep.subr.bf16.mxu0 %v857_v6  ;;  %v867_v15 = vld [vmem:[%s1198_s0 + $0x38] sm:$0xff]   ;;  %v484_v18 = vld [vmem:[%s1201_s3] sm:$0xff]  ;;  %v485_v19 = vld [vmem:[%s1201_s3 + $0x8] sm:$0xff]  ;;  %v1031_v45 = vand.u32 127, %v296_v42  ;;  %v895_v59 = vmov 1.0|1.0  }
  0x15   :  { %v486_v20 = vld [vmem:[%s1201_s3 + $0x10] sm:$0xff]  ;;  %v824_v21 = vpack.c.bf16 %v485_v19, %v484_v18  ;;  %v487_v22 = vld [vmem:[%s1201_s3 + $0x18] sm:$0xff]  ;;  %v488_v24 = vld [vmem:[%s1201_s3 + $0x20] sm:$0xff]  ;;  %v299_v44 = vadd.s32 16, %v1028_v43  ;;  %v300_v46 = vadd.s32 24, %v1028_v43  ;;  %v298_v47 = vadd.s32 8, %v1028_v43 }
  0x16   :  { %v827_v23 = vpack.c.bf16 %v487_v22, %v486_v20  ;;  %v489_v25 = vld [vmem:[%s1201_s3 + $0x28] sm:$0xff]  ;;  %v490_v27 = vld [vmem:[%s1201_s3 + $0x30] sm:$0xff]  ;;  %v491_v28 = vld [vmem:[%s1201_s3 + $0x38] sm:$0xff]  ;;  %vm348_vm3 = vcmp.ne.s32.totalorder %v1028_v43, %v1031_v45  ;;  %v303_v54 = vadd.s32 48, %v1028_v43  ;;  %v301_v56 = vadd.s32 32, %v1028_v43  ;;  %s579_s25 = sshll.u32 %s896_s24, 4  ;;  %s580_s25 = int_to_ptr.vmem [resolvable:$true] %s579_s25 }
  0x17   :  { %708 = vmatpush3.bf16.msra.mxu0 %v857_v6  ;;  %v830_v26 = vpack.c.bf16 %v489_v25, %v488_v24  ;;  %v833_v29 = vpack.c.bf16 %v491_v28, %v490_v27  ;;  %v492_v30 = vld [vmem:[%s1201_s3 + $0x40] sm:$0xff]  ;;  %v493_v31 = vld [vmem:[%s1201_s3 + $0x48] sm:$0xff]  ;;  %v494_v33 = vld [vmem:[%s1201_s3 + $0x50] sm:$0xff]  ;;  %vm350_vm2 = vcmp.ne.s32.totalorder %v299_v44, %v1031_v45  ;;  %vm351_vm5 = vcmp.ne.s32.totalorder %v300_v46, %v1031_v45  ;;  %s868_s26 = scalar_lea.vmem %s580_s25, 16  ;;  %s872_s27 = scalar_lea.vmem %s580_s25, 32 }
  0x18   :  { %709 = vmatprep.subr.bf16.mxu0 %v858_v7  ;;  %v836_v32 = vpack.c.bf16 %v493_v31, %v492_v30  ;;  %v495_v34 = vld [vmem:[%s1201_s3 + $0x58] sm:$0xff]  ;;  %v496_v36 = vld [vmem:[%s1201_s3 + $0x60] sm:$0xff]  ;;  %v497_v37 = vld [vmem:[%s1201_s3 + $0x68] sm:$0xff]  ;;  %vm349_vm10 = vcmp.ne.s32.totalorder %v298_v47, %v1031_v45  ;;  %v304_v57 = vadd.s32 56, %v1028_v43  ;;  %v302_v58 = vadd.s32 40, %v1028_v43  ;;  %p869_p0 = scmp.ne.s32.totalorder %s580_s25, %s868_s26  ;;  %p873_p1 = scmp.lt.s32.totalorder %s580_s25, %s580_s25 }
  0x19   :  { %v839_v35 = vpack.c.bf16 %v495_v34, %v494_v33  ;;  %v842_v38 = vpack.c.bf16 %v497_v37, %v496_v36  ;;  %v498_v39 = vld [vmem:[%s1201_s3 + $0x70] sm:$0xff]  ;;  %v499_v40 = vld [vmem:[%s1201_s3 + $0x78] sm:$0xff]  ;;  %v307_v2 = vadd.s32 80, %v1028_v43  ;;  %v305_v4 = vadd.s32 64, %v1028_v43  ;;  %v412_v27 = vld [vmem:[%s1200_s2] sm:$0x1]  ;;  %p874_p2 = scmp.lt.s32.totalorder %s872_s27, %s868_s26 }
  0x1a   :  { %v845_v41 = vpack.c.bf16 %v499_v40, %v498_v39  ;;  %v308_v5 = vadd.s32 88, %v1028_v43  ;;  %v312_v18 = vadd.s32 120, %v1028_v43  ;;  %v310_v20 = vadd.s32 104, %v1028_v43  ;;  %v483_v30 = vld [vmem:[#allocation2] sm:$0x1] }
  0x1b   :  { %710 = vmatpush3.bf16.msra.mxu0 %v858_v7  ;;  %v306_v7 = vadd.s32 72, %v1028_v43  ;;  %p875_p3 = por %p874_p2, %p873_p1 }
  0x1c   :  { %711 = vmatprep.subr.bf16.mxu0 %v859_v8 }
  0x1d   :  { %p876_p4 = pnand %p875_p3, %p869_p0 }
  0x1f   :  { %712 = vmatpush3.bf16.msra.mxu0 %v859_v8 }
  0x20   :  { %823 = vmatprep.subr.bf16.mxu0 %v892_v16 }
  0x22   :  { %714 = vmatmul.mubr.bf16.vlgmr.msra.gmra.mrb[0].mxu0 %v861_v9 }
  0x23   :  { %717 = vmatprep.mubr.bf16.mxu0 %v862_v10  ;;  %825 = vmatpush3.bf16.msra.mxu0 %v824_v21  ;;  %v1221_v10 = vmov 0 }
  0x24   :  { %826 = vmatprep.subr.bf16.mxu0 %v892_v16 }
  0x27   :  { %828 = vmatpush3.bf16.msra.mxu0 %v827_v23 }
  0x28   :  { %829 = vmatprep.subr.bf16.mxu0 %v892_v16 }
  0x2a   :  { %718 = vmatmul.mubr.bf16.gmra.mrb[4].mxu0 %v863_v11 }
  0x2b   :  { %721 = vmatprep.mubr.bf16.mxu0 %v864_v12  ;;  %831 = vmatpush3.bf16.msra.mxu0 %v830_v26  ;;  %v1223_v12 = vmov 0 }
  0x2c   :  { %832 = vmatprep.subr.bf16.mxu0 %v892_v16 }
  0x2f   :  { %834 = vmatpush3.bf16.msra.mxu0 %v833_v29 }
  0x30   :  { %835 = vmatprep.subr.bf16.mxu0 %v892_v16 }
  0x32   :  { %722 = vmatmul.mubr.bf16.gmra.mrb[8].mxu0 %v865_v13 }
  0x33   :  { %725 = vmatprep.mubr.bf16.mxu0 %v866_v14  ;;  %837 = vmatpush3.bf16.msra.mxu0 %v836_v32  ;;  %v311_v14 = vadd.s32 112, %v1028_v43 }
  0x34   :  { %838 = vmatprep.subr.bf16.mxu0 %v892_v16 }
  0x37   :  { %840 = vmatpush3.bf16.msra.mxu0 %v839_v35 }
  0x38   :  { %841 = vmatprep.subr.bf16.mxu0 %v892_v16 }
  0x3a   :  { %726 = vmatmul.mubr.bf16.gmra.mrb[12].mxu0 %v867_v15  ;;  %v1225_v15 = vmov 0 }
  0x3b   :  { %796 = vmatprep.mubr.msk.f32.mxu0 %vm894_vm1, %v893_v17  ;;  %843 = vmatpush3.bf16.msra.mxu0 %v842_v38  ;;  %vm354_vm1 = vcmp.ne.s32.totalorder %v303_v54, %v1031_v45  ;;  %v309_v17 = vadd.s32 96, %v1028_v43 }
  0x3c   :  { %844 = vmatprep.subr.bf16.mxu0 %v892_v16 }
  0x3f   :  { %846 = vmatpush3.bf16.msra.mxu0 %v845_v41 }
  0xf5   :  { %v715_v48 = vpop.f32.mrb[0].mxu0 }
  0xf6   :  { %vm334_vm4 = vcmp.gt.f32.partialorder %v715_v48, 0.0  ;;  %v231_v49 = vpop.f32.mrb[1].mxu0 }
  0xf7   :  { %vm1039_vm6 = vmand %vm334_vm4, %vm350_vm2  ;;  %vm332_vm7 = vcmp.gt.f32.partialorder %v231_v49, 0.0  ;;  %v716_v51 = vpop.f32.mrb[2].mxu0  ;;  %vm352_vm2 = vcmp.ne.s32.totalorder %v301_v56, %v1031_v45  ;;  %vm355_vm4 = vcmp.ne.s32.totalorder %v304_v57, %v1031_v45 }
  0xf8   :  { %vm1043_vm8 = vmand %vm332_vm7, %vm348_vm3  ;;  %vm335_vm9 = vcmp.gt.f32.partialorder %v716_v51, 0.0  ;;  %v234_v53 = vpop.f32.mrb[3].mxu0 }
  0xf9   :  { %vm1049_vm11 = vmand %vm335_vm9, %vm351_vm5  ;;  %vm333_vm12 = vcmp.gt.f32.partialorder %v234_v53, 0.0 }
  0xfa   :  { %vm803_vm13 = vmpackc.low %vm1049_vm11, %vm1039_vm6  ;;  %vm357_vm11 = vcmp.ne.s32.totalorder %v306_v7, %v1031_v45 }
  0xfb   :  { %vm365_vm14 = vmand %vm333_vm12, %vm349_vm10  ;;  %vm353_vm10 = vcmp.ne.s32.totalorder %v302_v58, %v1031_v45 }
  0xfc   :  { %vm800_vm15 = vmpackc.low %vm365_vm14, %vm1043_vm8 }
  0xfd   :  { %801 = vmatpush3.bf16.xpose.msk.msra.mxu1 %vm800_vm15, %v895_v59  ;;  %v719_v60 = vpop.f32.mrb[4].mxu0 }
  0xfe   :  { %vm338_vm3 = vcmp.gt.f32.partialorder %v719_v60, 0.0  ;;  %v247_v61 = vpop.f32.mrb[5].mxu0  ;;  %802 = vmatprep.subr.bf16.mxu1 %v892_v16 }
  0xff   :  { %vm1067_vm5 = vmand %vm338_vm3, %vm354_vm1  ;;  %vm336_vm7 = vcmp.gt.f32.partialorder %v247_v61, 0.0  ;;  %v720_v63 = vpop.f32.mrb[6].mxu0  ;;  %vm358_vm3 = vcmp.ne.s32.totalorder %v307_v2, %v1031_v45 }
 0x100   :  { %vm1071_vm8 = vmand %vm336_vm7, %vm352_vm2  ;;  %vm339_vm9 = vcmp.gt.f32.partialorder %v720_v63, 0.0  ;;  %v250_v1 = vpop.f32.mrb[7].mxu0 }
 0x101   :  { %vm1077_vm12 = vmand %vm339_vm9, %vm355_vm4  ;;  %vm337_vm14 = vcmp.gt.f32.partialorder %v250_v1, 0.0  ;;  %vm356_vm4 = vcmp.ne.s32.totalorder %v305_v4, %v1031_v45  ;;  %vm359_vm9 = vcmp.ne.s32.totalorder %v308_v5, %v1031_v45 }
 0x102   :  { %vm1087_vm1 = vmand %vm337_vm14, %vm353_vm10 }
 0x103   :  { %vm806_vm2 = vmpackc.low %vm1087_vm1, %vm1071_vm8  ;;  %vm361_vm1 = vcmp.ne.s32.totalorder %v310_v20, %v1031_v45 }
 0x105   :  { %804 = vmatpush3.bf16.xpose.msk.msra.mxu1 %vm803_vm13, %v895_v59  ;;  %v723_v8 = vpop.f32.mrb[8].mxu0 }
 0x106   :  { %805 = vmatprep.subr.bf16.mxu1 %v892_v16  ;;  %vm342_vm7 = vcmp.gt.f32.partialorder %v723_v8, 0.0  ;;  %v263_v9 = vpop.f32.mrb[9].mxu0 }
 0x107   :  { %vm1106_vm10 = vmand %vm342_vm7, %vm358_vm3  ;;  %vm340_vm14 = vcmp.gt.f32.partialorder %v263_v9, 0.0  ;;  %v724_v11 = vpop.f32.mrb[10].mxu0 }
 0x108   :  { %v1222_v10 = vsel %vm1106_vm10, 4294967295, %v1221_v10  ;;  %vm1110_vm0 = vmand %vm340_vm14, %vm356_vm4  ;;  %vm343_vm6 = vcmp.gt.f32.partialorder %v724_v11, 0.0  ;;  %v266_v13 = vpop.f32.mrb[11].mxu0  ;;  %vm362_vm14 = vcmp.ne.s32.totalorder %v311_v14, %v1031_v45 }
 0x109   :  { %v1224_v12 = vsel %vm1110_vm0, 4294967295, %v1223_v12  ;;  %vm1116_vm13 = vmand %vm343_vm6, %vm359_vm9  ;;  %vm341_vm3 = vcmp.gt.f32.partialorder %v266_v13, 0.0  ;;  %vm360_vm6 = vcmp.ne.s32.totalorder %v309_v17, %v1031_v45 }
 0x10a   :  { %v1226_v15 = vsel %vm1116_vm13, 4294967295, %v1225_v15  ;;  %vm1126_vm7 = vmand %vm341_vm3, %vm357_vm11  ;;  %vm363_vm3 = vcmp.ne.s32.totalorder %v312_v18, %v1031_v45 }
 0x10d   :  { %807 = vmatpush3.bf16.xpose.msk.msra.mxu1 %vm806_vm2, %v895_v59  ;;  %v727_v21 = vpop.f32.mrb[12].mxu0 }
 0x10e   :  { %808 = vmatprep.subr.bf16.mxu1 %v892_v16  ;;  %vm346_vm11 = vcmp.gt.f32.partialorder %v727_v21, 0.0  ;;  %v279_v22 = vpop.f32.mrb[13].mxu0 }
 0x10f   :  { %vm1145_vm4 = vmand %vm346_vm11, %vm362_vm14  ;;  %vm344_vm9 = vcmp.gt.f32.partialorder %v279_v22, 0.0  ;;  %v728_v24 = vpop.f32.mrb[14].mxu0 }
 0x110   :  { %vm1149_vm15 = vmand %vm344_vm9, %vm360_vm6  ;;  %vm347_vm8 = vcmp.gt.f32.partialorder %v728_v24, 0.0  ;;  %v282_v26 = vpop.f32.mrb[15].mxu0  ;;  %vm1234_vm6 = vnez %v1224_v12 }
 0x111   :  { %vm379_vm2 = vmand %vm347_vm8, %vm363_vm3  ;;  %vm345_vm10 = vcmp.gt.f32.partialorder %v282_v26, 0.0 }
 0x112   :  { %vm821_vm13 = vmpackc.low %vm379_vm2, %vm1145_vm4 }
 0x113   :  { %vm377_vm0 = vmand %vm345_vm10, %vm361_vm1 }
 0x114   :  { %vm818_vm14 = vmpackc.low %vm377_vm0, %vm1149_vm15  ;;  %vm1236_vm0 = vnez %v1226_v15  ;;  %vm1237_vm15 = vnez %v1222_v10 }
 0x115   :  { %vm1233_vm9 = vmpackc.low %vm1077_vm12, %vm1067_vm5  ;;  %vm1239_vm5 = vcmask 253952  }
 0x116   :  { %810 = vmatpush3.bf16.xpose.msk.msra.mxu1 %vm1233_vm9, %v895_v59  ;;  %vm1235_vm11 = vmpackc.low %vm1126_vm7, %vm1234_vm6 }
 0x117   :  { %811 = vmatprep.subr.bf16.mxu1 %v892_v16  ;;  %vm1238_vm10 = vmpackc.low %vm1236_vm0, %vm1237_vm15 }
 0x11e   :  { %813 = vmatpush3.bf16.xpose.msk.msra.mxu1 %vm1235_vm11, %v895_v59 }
 0x11f   :  { %814 = vmatprep.subr.bf16.mxu1 %v892_v16 }
 0x126   :  { %816 = vmatpush3.bf16.xpose.msk.msra.mxu1 %vm1238_vm10, %v895_v59 }
 0x127   :  { %817 = vmatprep.subr.bf16.mxu1 %v892_v16 }
 0x12e   :  { %819 = vmatpush3.bf16.xpose.msk.msra.mxu1 %vm818_vm14, %v895_v59 }
 0x12f   :  { %820 = vmatprep.subr.bf16.mxu1 %v892_v16 }
 0x136   :  { %822 = vmatpush3.bf16.xpose.msk.msra.mxu1 %vm821_vm13, %v895_v59 }
 0x13d   :  { %762 = vmatmul.mubr.f32.vlgmr.msra.gmra.mrb[0].mxu1 %v412_v27 }
 0x210   :  { %v479_v28 = vpop.f32.mrb[0].mxu1 }
 0x211   :  { %v763_v29 = vpop.f32.mrb[1].mxu1  ;;  %797 = vmatmul.mubr.f32.vlgmr.msra.gmra.mrb[16].mxu0 %v479_v28 }
 0x2e4   :  { %v566_v31 = vpop.f32.mrb[16].mxu0 }
 0x2e5   :  { %v570_v32 = vadd.f32 %v566_v31, %v483_v30  ;;  %v798_v33 = vpop.f32.mrb[17].mxu0 }
 0x2e7   :  { %572 = vst.msk [vmem:[#allocation2] sm:$0x1] %vm1239_vm5, %v570_v32 }
 0x2e8   :  { %879 = shalt.err (!%p876_p4)
}
 0x2e9   :  { %s880_s29 = scalar_lea.hbm %s1202_s4, 16 }
 0x2ea   :  { %p881_p5 = scmp.ne.s32.totalorder %s1202_s4, %s880_s29  ;;  %p884_p6 = scmp.lt.u32.totalorder %s880_s29, %s1202_s4 }
 0x2ec   :  { %p886_p7 = pnand %p884_p6, %p881_p5 }
 0x2ee   :  { %889 = shalt.err (!%p886_p7)
}
 0x2ef   :  { %582 = dma.vmem_to_hbm [thread:$0]  %s580_s25, 16, %s1202_s4, [#allocation3]  }
 0x2f0   :  { %890 = dma.done.wait [#allocation3], 16  }
 0x2f1   :  { %891 = vsyncadd [#allocation3], 4294967280 }
 0x2f2   :  { %586 = vsyncpa [#allocation3], 1 }

// kernel: tpu_custom_call.1
= control target key start
LH: loop header
LB: loop body
LE: loop exit
PB: predicated region body
PF: predicated region fallthrough
CT: control target
= control target key end

     0   :  { %s1198_s0 = inlined_call_operand.vmem [shape: bf16[128,128], index: 0, kind: input, shape index: {}]   ;;  %s1199_s1 = inlined_call_operand.vmem [shape: bf16[128,128], index: 1, kind: input, shape index: {}]   ;;  %s1200_s2 = inlined_call_operand.vmem [shape: f32[1,128], index: 2, kind: input, shape index: {}]   ;;  %s1201_s3 = inlined_call_operand.vmem [shape: f32[128,32], index: 3, kind: input, shape index: {}]   ;;  %s1202_s4 = inlined_call_operand.hbm [shape: f32[1,32], index: 4, kind: output, shape index: {}]  }
   0x1   :  { %v852_v0 = vld [vmem:[%s1199_s1] sm:$0xff]   ;;  %v853_v1 = vld [vmem:[%s1199_s1 + $0x8] sm:$0xff]   ;;  %v854_v2 = vld [vmem:[%s1199_s1 + $0x10] sm:$0xff]  }
   0x2   :  { %697 = vmatprep.subr.bf16.mxu0 %v852_v0  ;;  %v855_v3 = vld [vmem:[%s1199_s1 + $0x18] sm:$0xff]   ;;  %v860_v4 = vld [vmem:[%s1198_s0] sm:$0xff]   ;;  %v857_v6 = vld [vmem:[%s1199_s1 + $0x28] sm:$0xff]  }
   0x3   :  { %698 = vmatpush3.bf16.msra.mxu0 %v852_v0  ;;  %713 = vmatprep.mubr.bf16.mxu0 %v860_v4  ;;  %v856_v5 = vld [vmem:[%s1199_s1 + $0x20] sm:$0xff]  }
   0x4   :  { %699 = vmatprep.subr.bf16.mxu0 %v853_v1 }
   0x7   :  { %700 = vmatpush3.bf16.msra.mxu0 %v853_v1 }
   0x8   :  { %701 = vmatprep.subr.bf16.mxu0 %v854_v2 }
   0xb   :  { %702 = vmatpush3.bf16.msra.mxu0 %v854_v2 }
   0xc   :  { %703 = vmatprep.subr.bf16.mxu0 %v855_v3 }
   0xf   :  { %704 = vmatpush3.bf16.msra.mxu0 %v855_v3 }
  0x10   :  { %705 = vmatprep.subr.bf16.mxu0 %v856_v5 }
  0x11   :  { %9 = vsyncpa [#allocation3], 0  ;;  %v858_v7 = vld [vmem:[%s1199_s1 + $0x30] sm:$0xff]   ;;  %v859_v8 = vld [vmem:[%s1199_s1 + $0x38] sm:$0xff]   ;;  %v892_v16 = vmov 0.0|0.0   ;;  %vm1203_vm0 = vcmask 253952   ;;  %v296_v42 = vlaneseq }
  0x12   :  { %v861_v9 = vld [vmem:[%s1198_s0 + $0x8] sm:$0xff]   ;;  %v862_v10 = vld [vmem:[%s1198_s0 + $0x10] sm:$0xff]   ;;  %v863_v11 = vld [vmem:[%s1198_s0 + $0x18] sm:$0xff]   ;;  %799 = vmatprep.subr.bf16.mxu1 %v892_v16  ;;  %v893_v17 = vmov 0.0   ;;  %vm894_vm1 = vmmov 0   ;;  %s896_s24 = smov [#allocation2]  }
  0x13   :  { %706 = vmatpush3.bf16.msra.mxu0 %v856_v5  ;;  %v864_v12 = vld [vmem:[%s1198_s0 + $0x20] sm:$0xff]   ;;  %v865_v13 = vld [vmem:[%s1198_s0 + $0x28] sm:$0xff]   ;;  %v866_v14 = vld [vmem:[%s1198_s0 + $0x30] sm:$0xff]   ;;  %68 = vst.msk [vmem:[#allocation2] sm:$0x1] %vm1203_vm0, %v893_v17  ;;  %761 = vmatprep.mubr.msk.f32.mxu1 %vm894_vm1, %v893_v17  ;;  %v1028_v43 = vshrl.u32 %v296_v42, 7 }
  0x14   :  { %707 = vmatprep.subr.bf16.mxu0 %v857_v6  ;;  %v867_v15 = vld [vmem:[%s1198_s0 + $0x38] sm:$0xff]   ;;  %v484_v18 = vld [vmem:[%s1201_s3] sm:$0xff]  ;;  %v485_v19 = vld [vmem:[%s1201_s3 + $0x8] sm:$0xff]  ;;  %v1031_v45 = vand.u32 127, %v296_v42  ;;  %v895_v59 = vmov 1.0|1.0  }
  0x15   :  { %v486_v20 = vld [vmem:[%s1201_s3 + $0x10] sm:$0xff]  ;;  %v824_v21 = vpack.c.bf16 %v485_v19, %v484_v18  ;;  %v487_v22 = vld [vmem:[%s1201_s3 + $0x18] sm:$0xff]  ;;  %v488_v24 = vld [vmem:[%s1201_s3 + $0x20] sm:$0xff]  ;;  %v299_v44 = vadd.s32 16, %v1028_v43  ;;  %v300_v46 = vadd.s32 24, %v1028_v43  ;;  %v298_v47 = vadd.s32 8, %v1028_v43 }
  0x16   :  { %v827_v23 = vpack.c.bf16 %v487_v22, %v486_v20  ;;  %v489_v25 = vld [vmem:[%s1201_s3 + $0x28] sm:$0xff]  ;;  %v490_v27 = vld [vmem:[%s1201_s3 + $0x30] sm:$0xff]  ;;  %v491_v28 = vld [vmem:[%s1201_s3 + $0x38] sm:$0xff]  ;;  %vm348_vm3 = vcmp.ne.s32.totalorder %v1028_v43, %v1031_v45  ;;  %v303_v54 = vadd.s32 48, %v1028_v43  ;;  %v301_v56 = vadd.s32 32, %v1028_v43  ;;  %s579_s25 = sshll.u32 %s896_s24, 4  ;;  %s580_s25 = int_to_ptr.vmem [resolvable:$true] %s579_s25 }
  0x17   :  { %708 = vmatpush3.bf16.msra.mxu0 %v857_v6  ;;  %v830_v26 = vpack.c.bf16 %v489_v25, %v488_v24  ;;  %v833_v29 = vpack.c.bf16 %v491_v28, %v490_v27  ;;  %v492_v30 = vld [vmem:[%s1201_s3 + $0x40] sm:$0xff]  ;;  %v493_v31 = vld [vmem:[%s1201_s3 + $0x48] sm:$0xff]  ;;  %v494_v33 = vld [vmem:[%s1201_s3 + $0x50] sm:$0xff]  ;;  %vm350_vm2 = vcmp.ne.s32.totalorder %v299_v44, %v1031_v45  ;;  %vm351_vm5 = vcmp.ne.s32.totalorder %v300_v46, %v1031_v45  ;;  %s868_s26 = scalar_lea.vmem %s580_s25, 16  ;;  %s872_s27 = scalar_lea.vmem %s580_s25, 32 }
  0x18   :  { %709 = vmatprep.subr.bf16.mxu0 %v858_v7  ;;  %v836_v32 = vpack.c.bf16 %v493_v31, %v492_v30  ;;  %v495_v34 = vld [vmem:[%s1201_s3 + $0x58] sm:$0xff]  ;;  %v496_v36 = vld [vmem:[%s1201_s3 + $0x60] sm:$0xff]  ;;  %v497_v37 = vld [vmem:[%s1201_s3 + $0x68] sm:$0xff]  ;;  %vm349_vm10 = vcmp.ne.s32.totalorder %v298_v47, %v1031_v45  ;;  %v304_v57 = vadd.s32 56, %v1028_v43  ;;  %v302_v58 = vadd.s32 40, %v1028_v43  ;;  %p869_p0 = scmp.ne.s32.totalorder %s580_s25, %s868_s26  ;;  %p873_p1 = scmp.lt.s32.totalorder %s580_s25, %s580_s25 }
  0x19   :  { %v839_v35 = vpack.c.bf16 %v495_v34, %v494_v33  ;;  %v842_v38 = vpack.c.bf16 %v497_v37, %v496_v36  ;;  %v498_v39 = vld [vmem:[%s1201_s3 + $0x70] sm:$0xff]  ;;  %v499_v40 = vld [vmem:[%s1201_s3 + $0x78] sm:$0xff]  ;;  %v307_v2 = vadd.s32 80, %v1028_v43  ;;  %v305_v4 = vadd.s32 64, %v1028_v43  ;;  %v412_v27 = vld [vmem:[%s1200_s2] sm:$0x1]  ;;  %p874_p2 = scmp.lt.s32.totalorder %s872_s27, %s868_s26 }
  0x1a   :  { %v845_v41 = vpack.c.bf16 %v499_v40, %v498_v39  ;;  %v308_v5 = vadd.s32 88, %v1028_v43  ;;  %v312_v18 = vadd.s32 120, %v1028_v43  ;;  %v310_v20 = vadd.s32 104, %v1028_v43  ;;  %v483_v30 = vld [vmem:[#allocation2] sm:$0x1] }
  0x1b   :  { %710 = vmatpush3.bf16.msra.mxu0 %v858_v7  ;;  %v306_v7 = vadd.s32 72, %v1028_v43  ;;  %p875_p3 = por %p874_p2, %p873_p1 }
  0x1c   :  { %711 = vmatprep.subr.bf16.mxu0 %v859_v8 }
  0x1d   :  { %p876_p4 = pnand %p875_p3, %p869_p0 }
  0x1f   :  { %712 = vmatpush3.bf16.msra.mxu0 %v859_v8 }
  0x20   :  { %823 = vmatprep.subr.bf16.mxu0 %v892_v16 }
  0x22   :  { %714 = vmatmul.mubr.bf16.vlgmr.msra.gmra.mrb[0].mxu0 %v861_v9 }
  0x23   :  { %717 = vmatprep.mubr.bf16.mxu0 %v862_v10  ;;  %825 = vmatpush3.bf16.msra.mxu0 %v824_v21  ;;  %v1221_v10 = vmov 0 }
  0x24   :  { %826 = vmatprep.subr.bf16.mxu0 %v892_v16 }
  0x27   :  { %828 = vmatpush3.bf16.msra.mxu0 %v827_v23 }
  0x28   :  { %829 = vmatprep.subr.bf16.mxu0 %v892_v16 }
  0x2a   :  { %718 = vmatmul.mubr.bf16.gmra.mrb[4].mxu0 %v863_v11 }
  0x2b   :  { %721 = vmatprep.mubr.bf16.mxu0 %v864_v12  ;;  %831 = vmatpush3.bf16.msra.mxu0 %v830_v26  ;;  %v1223_v12 = vmov 0 }
  0x2c   :  { %832 = vmatprep.subr.bf16.mxu0 %v892_v16 }
  0x2f   :  { %834 = vmatpush3.bf16.msra.mxu0 %v833_v29 }
  0x30   :  { %835 = vmatprep.subr.bf16.mxu0 %v892_v16 }
  0x32   :  { %722 = vmatmul.mubr.bf16.gmra.mrb[8].mxu0 %v865_v13 }
  0x33   :  { %725 = vmatprep.mubr.bf16.mxu0 %v866_v14  ;;  %837 = vmatpush3.bf16.msra.mxu0 %v836_v32  ;;  %v311_v14 = vadd.s32 112, %v1028_v43 }
  0x34   :  { %838 = vmatprep.subr.bf16.mxu0 %v892_v16 }
  0x37   :  { %840 = vmatpush3.bf16.msra.mxu0 %v839_v35 }
  0x38   :  { %841 = vmatprep.subr.bf16.mxu0 %v892_v16 }
  0x3a   :  { %726 = vmatmul.mubr.bf16.gmra.mrb[12].mxu0 %v867_v15  ;;  %v1225_v15 = vmov 0 }
  0x3b   :  { %796 = vmatprep.mubr.msk.f32.mxu0 %vm894_vm1, %v893_v17  ;;  %843 = vmatpush3.bf16.msra.mxu0 %v842_v38  ;;  %vm354_vm1 = vcmp.ne.s32.totalorder %v303_v54, %v1031_v45  ;;  %v309_v17 = vadd.s32 96, %v1028_v43 }
  0x3c   :  { %844 = vmatprep.subr.bf16.mxu0 %v892_v16 }
  0x3f   :  { %846 = vmatpush3.bf16.msra.mxu0 %v845_v41 }
  0xf5   :  { %v715_v48 = vpop.f32.mrb[0].mxu0 }
  0xf6   :  { %vm334_vm4 = vcmp.gt.f32.partialorder %v715_v48, 0.0  ;;  %v231_v49 = vpop.f32.mrb[1].mxu0 }
  0xf7   :  { %vm1039_vm6 = vmand %vm334_vm4, %vm350_vm2  ;;  %vm332_vm7 = vcmp.gt.f32.partialorder %v231_v49, 0.0  ;;  %v716_v51 = vpop.f32.mrb[2].mxu0  ;;  %vm352_vm2 = vcmp.ne.s32.totalorder %v301_v56, %v1031_v45  ;;  %vm355_vm4 = vcmp.ne.s32.totalorder %v304_v57, %v1031_v45 }
  0xf8   :  { %vm1043_vm8 = vmand %vm332_vm7, %vm348_vm3  ;;  %vm335_vm9 = vcmp.gt.f32.partialorder %v716_v51, 0.0  ;;  %v234_v53 = vpop.f32.mrb[3].mxu0 }
  0xf9   :  { %vm1049_vm11 = vmand %vm335_vm9, %vm351_vm5  ;;  %vm333_vm12 = vcmp.gt.f32.partialorder %v234_v53, 0.0 }
  0xfa   :  { %vm803_vm13 = vmpackc.low %vm1049_vm11, %vm1039_vm6  ;;  %vm357_vm11 = vcmp.ne.s32.totalorder %v306_v7, %v1031_v45 }
  0xfb   :  { %vm365_vm14 = vmand %vm333_vm12, %vm349_vm10  ;;  %vm353_vm10 = vcmp.ne.s32.totalorder %v302_v58, %v1031_v45 }
  0xfc   :  { %vm800_vm15 = vmpackc.low %vm365_vm14, %vm1043_vm8 }
  0xfd   :  { %801 = vmatpush3.bf16.xpose.msk.msra.mxu1 %vm800_vm15, %v895_v59  ;;  %v719_v60 = vpop.f32.mrb[4].mxu0 }
  0xfe   :  { %vm338_vm3 = vcmp.gt.f32.partialorder %v719_v60, 0.0  ;;  %v247_v61 = vpop.f32.mrb[5].mxu0  ;;  %802 = vmatprep.subr.bf16.mxu1 %v892_v16 }
  0xff   :  { %vm1067_vm5 = vmand %vm338_vm3, %vm354_vm1  ;;  %vm336_vm7 = vcmp.gt.f32.partialorder %v247_v61, 0.0  ;;  %v720_v63 = vpop.f32.mrb[6].mxu0  ;;  %vm358_vm3 = vcmp.ne.s32.totalorder %v307_v2, %v1031_v45 }
 0x100   :  { %vm1071_vm8 = vmand %vm336_vm7, %vm352_vm2  ;;  %vm339_vm9 = vcmp.gt.f32.partialorder %v720_v63, 0.0  ;;  %v250_v1 = vpop.f32.mrb[7].mxu0 }
 0x101   :  { %vm1077_vm12 = vmand %vm339_vm9, %vm355_vm4  ;;  %vm337_vm14 = vcmp.gt.f32.partialorder %v250_v1, 0.0  ;;  %vm356_vm4 = vcmp.ne.s32.totalorder %v305_v4, %v1031_v45  ;;  %vm359_vm9 = vcmp.ne.s32.totalorder %v308_v5, %v1031_v45 }
 0x102   :  { %vm1087_vm1 = vmand %vm337_vm14, %vm353_vm10 }
 0x103   :  { %vm806_vm2 = vmpackc.low %vm1087_vm1, %vm1071_vm8  ;;  %vm361_vm1 = vcmp.ne.s32.totalorder %v310_v20, %v1031_v45 }
 0x105   :  { %804 = vmatpush3.bf16.xpose.msk.msra.mxu1 %vm803_vm13, %v895_v59  ;;  %v723_v8 = vpop.f32.mrb[8].mxu0 }
 0x106   :  { %805 = vmatprep.subr.bf16.mxu1 %v892_v16  ;;  %vm342_vm7 = vcmp.gt.f32.partialorder %v723_v8, 0.0  ;;  %v263_v9 = vpop.f32.mrb[9].mxu0 }
 0x107   :  { %vm1106_vm10 = vmand %vm342_vm7, %vm358_vm3  ;;  %vm340_vm14 = vcmp.gt.f32.partialorder %v263_v9, 0.0  ;;  %v724_v11 = vpop.f32.mrb[10].mxu0 }
 0x108   :  { %v1222_v10 = vsel %vm1106_vm10, 4294967295, %v1221_v10  ;;  %vm1110_vm0 = vmand %vm340_vm14, %vm356_vm4  ;;  %vm343_vm6 = vcmp.gt.f32.partialorder %v724_v11, 0.0  ;;  %v266_v13 = vpop.f32.mrb[11].mxu0  ;;  %vm362_vm14 = vcmp.ne.s32.totalorder %v311_v14, %v1031_v45 }
 0x109   :  { %v1224_v12 = vsel %vm1110_vm0, 4294967295, %v1223_v12  ;;  %vm1116_vm13 = vmand %vm343_vm6, %vm359_vm9  ;;  %vm341_vm3 = vcmp.gt.f32.partialorder %v266_v13, 0.0  ;;  %vm360_vm6 = vcmp.ne.s32.totalorder %v309_v17, %v1031_v45 }
 0x10a   :  { %v1226_v15 = vsel %vm1116_vm13, 4294967295, %v1225_v15  ;;  %vm1126_vm7 = vmand %vm341_vm3, %vm357_vm11  ;;  %vm363_vm3 = vcmp.ne.s32.totalorder %v312_v18, %v1031_v45 }
 0x10d   :  { %807 = vmatpush3.bf16.xpose.msk.msra.mxu1 %vm806_vm2, %v895_v59  ;;  %v727_v21 = vpop.f32.mrb[12].mxu0 }
 0x10e   :  { %808 = vmatprep.subr.bf16.mxu1 %v892_v16  ;;  %vm346_vm11 = vcmp.gt.f32.partialorder %v727_v21, 0.0  ;;  %v279_v22 = vpop.f32.mrb[13].mxu0 }
 0x10f   :  { %vm1145_vm4 = vmand %vm346_vm11, %vm362_vm14  ;;  %vm344_vm9 = vcmp.gt.f32.partialorder %v279_v22, 0.0  ;;  %v728_v24 = vpop.f32.mrb[14].mxu0 }
 0x110   :  { %vm1149_vm15 = vmand %vm344_vm9, %vm360_vm6  ;;  %vm347_vm8 = vcmp.gt.f32.partialorder %v728_v24, 0.0  ;;  %v282_v26 = vpop.f32.mrb[15].mxu0  ;;  %vm1234_vm6 = vnez %v1224_v12 }
 0x111   :  { %vm379_vm2 = vmand %vm347_vm8, %vm363_vm3  ;;  %vm345_vm10 = vcmp.gt.f32.partialorder %v282_v26, 0.0 }
 0x112   :  { %vm821_vm13 = vmpackc.low %vm379_vm2, %vm1145_vm4 }
 0x113   :  { %vm377_vm0 = vmand %vm345_vm10, %vm361_vm1 }
 0x114   :  { %vm818_vm14 = vmpackc.low %vm377_vm0, %vm1149_vm15  ;;  %vm1236_vm0 = vnez %v1226_v15  ;;  %vm1237_vm15 = vnez %v1222_v10 }
 0x115   :  { %vm1233_vm9 = vmpackc.low %vm1077_vm12, %vm1067_vm5  ;;  %vm1239_vm5 = vcmask 253952  }
 0x116   :  { %810 = vmatpush3.bf16.xpose.msk.msra.mxu1 %vm1233_vm9, %v895_v59  ;;  %vm1235_vm11 = vmpackc.low %vm1126_vm7, %vm1234_vm6 }
 0x117   :  { %811 = vmatprep.subr.bf16.mxu1 %v892_v16  ;;  %vm1238_vm10 = vmpackc.low %vm1236_vm0, %vm1237_vm15 }
 0x11e   :  { %813 = vmatpush3.bf16.xpose.msk.msra.mxu1 %vm1235_vm11, %v895_v59 }
 0x11f   :  { %814 = vmatprep.subr.bf16.mxu1 %v892_v16 }
 0x126   :  { %816 = vmatpush3.bf16.xpose.msk.msra.mxu1 %vm1238_vm10, %v895_v59 }
 0x127   :  { %817 = vmatprep.subr.bf16.mxu1 %v892_v16 }
 0x12e   :  { %819 = vmatpush3.bf16.xpose.msk.msra.mxu1 %vm818_vm14, %v895_v59 }
 0x12f   :  { %820 = vmatprep.subr.bf16.mxu1 %v892_v16 }
 0x136   :  { %822 = vmatpush3.bf16.xpose.msk.msra.mxu1 %vm821_vm13, %v895_v59 }
 0x13d   :  { %762 = vmatmul.mubr.f32.vlgmr.msra.gmra.mrb[0].mxu1 %v412_v27 }
 0x210   :  { %v479_v28 = vpop.f32.mrb[0].mxu1 }
 0x211   :  { %v763_v29 = vpop.f32.mrb[1].mxu1  ;;  %797 = vmatmul.mubr.f32.vlgmr.msra.gmra.mrb[16].mxu0 %v479_v28 }
 0x2e4   :  { %v566_v31 = vpop.f32.mrb[16].mxu0 }
 0x2e5   :  { %v570_v32 = vadd.f32 %v566_v31, %v483_v30  ;;  %v798_v33 = vpop.f32.mrb[17].mxu0 }
 0x2e7   :  { %572 = vst.msk [vmem:[#allocation2] sm:$0x1] %vm1239_vm5, %v570_v32 }
 0x2e8   :  { %879 = shalt.err (!%p876_p4)
}
 0x2e9   :  { %s880_s29 = scalar_lea.hbm %s1202_s4, 16 }
 0x2ea   :  { %p881_p5 = scmp.ne.s32.totalorder %s1202_s4, %s880_s29  ;;  %p884_p6 = scmp.lt.u32.totalorder %s880_s29, %s1202_s4 }
 0x2ec   :  { %p886_p7 = pnand %p884_p6, %p881_p5 }
 0x2ee   :  { %889 = shalt.err (!%p886_p7)
}
 0x2ef   :  { %582 = dma.vmem_to_hbm [thread:$0]  %s580_s25, 16, %s1202_s4, [#allocation3]  }
 0x2f0   :  { %890 = dma.done.wait [#allocation3], 16  }
 0x2f1   :  { %891 = vsyncadd [#allocation3], 4294967280 }
 0x2f2   :  { %586 = vsyncpa [#allocation3], 1 }

</bundles_post_ra>
